<compile_context>
chip_gen: v7x
topology: tpu7x:2x2x1
jax: 0.10.0
libtpu: 0.0.40
codegen_flags: <defaults>
</compile_context>

<pallas_src>
import numpy as np
import jax
import jax.numpy as jnp
from jax.experimental import pallas as pl
from jax.experimental.pallas import tpu as pltpu


# ----------------------------- device kernel ------------------------------ #

def _neg_gather_kernel(idx_ref, embs_ref, out_ref, s_ref):
    """Row gather as a one-hot matmul.

    idx_ref : (RB, 1) int32   — source batch row for each output row
    embs_ref: (B, TD)         — embeddings (full batch, one D tile)
    out_ref : (RB, TD)        — gathered rows
    s_ref   : (RB, B) scratch — 0/1 selection matrix, cached across D tiles
    """
    # Rebuild S only on the first D-tile of each row block.  The D axis is the
    # innermost (sequential, "arbitrary") grid axis and scratch persists across
    # grid iterations, so the cache is valid for all D tiles of this row block.
    @pl.when(pl.program_id(1) == 0)
    def _():
        rows, batch = s_ref.shape
        col = jax.lax.broadcasted_iota(jnp.int32, (rows, batch), 1)
        s_ref[...] = (idx_ref[...] == col).astype(s_ref.dtype)

    # Gather on the MXU in the native embedding dtype (S is exactly 0/1 so a
    # bf16 matmul stays exact); accumulate in f32, cast on the store.
    out_ref[...] = jnp.dot(
        s_ref[...], embs_ref[...], preferred_element_type=jnp.float32
    ).astype(out_ref.dtype)


# ------------------------------ host helpers ------------------------------ #

def _round_up(x, m):
    return (x + m - 1) // m * m


def _pick_row_block(total_rows, cap=512):
    """Largest multiple of 8 that divides total_rows, capped (rows of S per step)."""
    if total_rows <= cap:
        return total_rows
    best = 8
    for rb in range(8, cap + 1, 8):
        if total_rows % rb == 0:
            best = rb
    return best


def _pick_d_tile(d_pad, cap=512):
    """Largest multiple of 128 that divides d_pad, capped (lanes per step)."""
    if d_pad <= cap:
        return d_pad
    best = 128
    for td in range(128, cap + 1, 128):
        if d_pad % td == 0:
            best = td
    return best


def _build_negative_index_table(label_np, pad_mode, seed):
    """Vectorized numpy construction of the (B, num_neg) negative index table.

    'max': all true negatives in index order, then oversample with replacement
           (mirrors torch.randint over the negative set).
    'min': negatives in index order when count == min_count, otherwise a
           uniform random subset without replacement (torch.randperm[:min]).
    """
    B = label_np.shape[0]
    rng = np.random.default_rng(int(seed))
    neq = label_np[:, None] != label_np[None, :]            # True where negative
    n_negs = neq.sum(axis=1).astype(np.int64)
    num_neg = int(n_negs.max() if pad_mode == 'max' else n_negs.min())
    if num_neg == 0:
        return np.zeros((B, 0), np.int32), 0
    if pad_mode == 'max' and int(n_negs.min()) == 0:
        raise ValueError("an anchor has no negatives to oversample from")

    # Negatives-first ordering per row (stable keeps original index order).
    order = np.argsort(~neq, axis=1, kind='stable')
    slot = np.arange(num_neg)[None, :]
    if pad_mode == 'max':
        rand = rng.integers(0, np.maximum(n_negs, 1)[:, None], size=(B, num_neg))
        pos = np.where(slot < n_negs[:, None], slot, rand)
        idx = np.take_along_axis(order, pos, axis=1)
    else:
        # TODO(synk): RNG stream differs from torch.randperm; the distribution
        # (uniform subset without replacement when count > min) matches.
        keys = rng.random((B, B))
        keys[~neq] = np.inf
        rnd_order = np.argsort(keys, axis=1, kind='stable')
        idx = np.where(n_negs[:, None] > num_neg,
                       rnd_order[:, :num_neg], order[:, :num_neg])
    return idx.astype(np.int32), num_neg


# ------------------------------ public entry ------------------------------ #

def negative_sampler(embs, label, pad_mode='max', seed=0):
    if pad_mode not in ('min', 'max'):
        raise ValueError("pad_mode must be either 'min' or 'max'")
    embs = jnp.asarray(embs)
    B, D = embs.shape
    # Output shape is data-dependent on the label values -> labels must be
    # concrete on host (mirrors torch's .item() usage in the reference module).
    label_np = np.asarray(jax.device_get(label)).reshape(-1).astype(np.int64)
    if label_np.shape[0] != B:
        raise ValueError("label must have shape (batch_size,)")

    idx, num_neg = _build_negative_index_table(label_np, pad_mode, seed)
    if num_neg == 0:
        return jnp.zeros((B, 0, D), dtype=embs.dtype)

    # Pad to TPU-friendly tiles: negatives -> multiple of 8 (sublanes),
    # hidden dim -> multiple of 128 (lane-dense, unmasked stores).
    nneg_pad = _round_up(num_neg, 8)
    d_pad = _round_up(D, 128)
    if nneg_pad != num_neg:
        # Padded rows just gather batch row 0; they are trimmed after the call.
        idx = np.pad(idx, ((0, 0), (0, nneg_pad - num_neg)))
    embs_dev = embs if d_pad == D else jnp.pad(embs, ((0, 0), (0, d_pad - D)))

    total_rows = B * nneg_pad
    rb = _pick_row_block(total_rows)        # output rows (anchor, neg) per grid step
    td = _pick_d_tile(d_pad)                # hidden-dim lanes per grid step
    idx_col = jnp.asarray(idx.reshape(total_rows, 1))

    itemsize = jnp.dtype(embs.dtype).itemsize
    vmem_need = (2 * rb * 128 * 4            # idx column blocks (lane-padded), double buffered
                 + 2 * B * td * itemsize     # embs tiles, double buffered
                 + 2 * rb * td * itemsize    # output tiles, double buffered
                 + rb * max(B, 128) * itemsize   # selection-matrix scratch (lane-padded)
                 + rb * td * 4)              # f32 matmul accumulator
    vmem_limit = int(min(max(2 * vmem_need, 16 << 20), 48 << 20))

    out2d = pl.pallas_call(
        _neg_gather_kernel,
        out_shape=jax.ShapeDtypeStruct((total_rows, d_pad), embs.dtype),
        grid_spec=pltpu.PrefetchScalarGridSpec(
            num_scalar_prefetch=0,
            grid=(total_rows // rb, d_pad // td),
            in_specs=[
                pl.BlockSpec((rb, 1), lambda i, j: (i, 0)),   # index column
                pl.BlockSpec((B, td), lambda i, j: (0, j)),   # embeddings D tile
            ],
            out_specs=pl.BlockSpec((rb, td), lambda i, j: (i, j)),
            scratch_shapes=[pltpu.VMEM((rb, B), embs.dtype)],
        ),
        compiler_params=pltpu.CompilerParams(
            dimension_semantics=("parallel", "arbitrary"),
            vmem_limit_bytes=vmem_limit),
    )(idx_col, embs_dev)

    # Trim padding and restore (batch, num_negatives, hidden).
    return out2d.reshape(B, nneg_pad, d_pad)[:, :num_neg, :D]


# ---------------------------------- demo ----------------------------------- #

if __name__ == "__main__":
    key = jax.random.PRNGKey(0)
    B, D = 8, 32
    embs = jax.random.normal(key, (B, D), dtype=jnp.float32)
    label = jnp.array([0, 0, 0, 1, 1, 2, 2, 2], dtype=jnp.int32)

    out_max = jax.block_until_ready(negative_sampler(embs, label, pad_mode='max', seed=0))
    out_min = jax.block_until_ready(negative_sampler(embs, label, pad_mode='min', seed=0))

    e = np.asarray(embs)
    l = np.asarray(jax.device_get(label))
    counts = np.array([(l != v).sum() for v in np.unique(l)])
    max_c, min_c = int(counts.max()), int(counts.min())
    assert out_max.shape == (B, max_c, D), out_max.shape
    assert out_min.shape == (B, min_c, D), out_min.shape

    for i in range(B):
        neg = e[l != l[i]]
        n = neg.shape[0]
        # 'max': true negatives first (in index order), then re-draws from the set.
        np.testing.assert_allclose(np.asarray(out_max[i, :n]), neg, rtol=1e-5, atol=1e-5)
        for j in range(n, max_c):
            row = np.asarray(out_max[i, j])
            assert np.any(np.all(np.isclose(row, neg, atol=1e-5), axis=1)), \
                "oversampled row is not a member of the negative set"
        # 'min': a subset of the negatives, without replacement.
        picked = []
        for j in range(min_c):
            row = np.asarray(out_min[i, j])
            dist = np.abs(neg - row).max(axis=1)
            k = int(np.argmin(dist))
            assert dist[k] < 1e-5, "undersampled row is not in the negative set"
            picked.append(k)
        assert len(set(picked)) == min_c, "undersampled rows are not distinct"

    print("KERNEL_OK")
</pallas_src>

<mosaic_0001>
module attributes {stable_mosaic.version = 11 : i64} {
  func.func @_neg_gather_kernel(%arg0: i32, %arg1: i32, %arg2: memref<64x1xi32, #tpu.memory_space<vmem>>, %arg3: memref<8x128xf32, #tpu.memory_space<vmem>>, %arg4: memref<64x128xf32, #tpu.memory_space<vmem>>, %arg5: memref<64x8xf32, #tpu.memory_space<vmem>>) attributes {dimension_semantics = [#tpu.dimension_semantics<parallel>, #tpu.dimension_semantics<arbitrary>], iteration_bounds = array<i64: 1, 1>, scalar_prefetch = 0 : i64, scratch_operands = 1 : i64, tpu.core_type = #tpu.core_type<tc>, window_params = [{transform_indices = @transform_0, window_bounds = array<i64: 64, 1>}, {transform_indices = @transform_1, window_bounds = array<i64: 8, 128>}, {transform_indices = @transform_2, window_bounds = array<i64: 64, 128>}]} {
    %c0_i32 = arith.constant 0 : i32
    %0 = arith.cmpi eq, %arg1, %c0_i32 : i32
    %1 = arith.extui %0 : i1 to i32
    %c0_i32_0 = arith.constant 0 : i32
    %2 = arith.cmpi ne, %1, %c0_i32_0 : i32
    scf.if %2 {
      %7 = tpu.iota {dimensions = array<i32: 1>} : vector<64x8xi32>
      %c0_6 = arith.constant 0 : index
      %c0_7 = arith.constant 0 : index
      %8 = vector.load %arg2[%c0_6, %c0_7] : memref<64x1xi32, #tpu.memory_space<vmem>>, vector<64x1xi32>
      %9 = vector.broadcast %8 : vector<64x1xi32> to vector<64x8xi32>
      %10 = arith.cmpi eq, %9, %7 : vector<64x8xi32>
      %11 = arith.extui %10 : vector<64x8xi1> to vector<64x8xi32>
      %12 = arith.sitofp %11 : vector<64x8xi32> to vector<64x8xf32>
      %c0_8 = arith.constant 0 : index
      %c0_9 = arith.constant 0 : index
      %13 = vector.load %arg5[%c0_8, %c0_9] : memref<64x8xf32, #tpu.memory_space<vmem>>, vector<64x8xf32>
      tpu.vector_store %arg5[%c0_8, %c0_9], %12 {strides = array<i32>} : memref<64x8xf32, #tpu.memory_space<vmem>>, vector<64x8xf32>,
    } else {
    }
    %c0 = arith.constant 0 : index
    %c0_1 = arith.constant 0 : index
    %3 = vector.load %arg5[%c0, %c0_1] : memref<64x8xf32, #tpu.memory_space<vmem>>, vector<64x8xf32>
    %c0_2 = arith.constant 0 : index
    %c0_3 = arith.constant 0 : index
    %4 = vector.load %arg3[%c0_2, %c0_3] : memref<8x128xf32, #tpu.memory_space<vmem>>, vector<8x128xf32>
    %cst = arith.constant dense<0.000000e+00> : vector<64x128xf32>
    %5 = tpu.matmul %3, %4, %cst {dimension_numbers = #tpu.dot_dimension_numbers<[1], [0], [0], [1], [0, 0, 1, 1], [], []>} : vector<64x8xf32>, vector<8x128xf32>, vector<64x128xf32> -> vector<64x128xf32>
    %c0_4 = arith.constant 0 : index
    %c0_5 = arith.constant 0 : index
    %6 = vector.load %arg4[%c0_4, %c0_5] : memref<64x128xf32, #tpu.memory_space<vmem>>, vector<64x128xf32>
    tpu.vector_store %arg4[%c0_4, %c0_5], %5 {strides = array<i32>} : memref<64x128xf32, #tpu.memory_space<vmem>>, vector<64x128xf32>,
    return
  }
  func.func @transform_0(%arg0: i32, %arg1: i32) -> (i32, i32) {
    %c0_i32 = arith.constant 0 : i32
    %c0_i32_0 = arith.constant 0 : i32
    return %arg0, %c0_i32 : i32, i32
  }
  func.func @transform_1(%arg0: i32, %arg1: i32) -> (i32, i32) {
    %c0_i32 = arith.constant 0 : i32
    %c0_i32_0 = arith.constant 0 : i32
    return %c0_i32, %arg1 : i32, i32
  }
  func.func @transform_2(%arg0: i32, %arg1: i32) -> (i32, i32) {
    %c0_i32 = arith.constant 0 : i32
    return %arg0, %arg1 : i32, i32
  }
}

</mosaic_0001>

<bundles_post_ra>
// kernel: tpu_custom_call.1
= control target key start
LH: loop header
LB: loop body
LE: loop exit
PB: predicated region body
PF: predicated region fallthrough
CT: control target
= control target key end

     0   :  { %v318_v2 = vmov 0   ;;  %s393_s0 = inlined_call_operand.vmem [shape: s32[64,1], index: 0, kind: input, shape index: {}]   ;;  %s394_s1 = inlined_call_operand.vmem [shape: f32[8,128], index: 1, kind: input, shape index: {}]   ;;  %s395_s2 = inlined_call_operand.hbm [shape: f32[64,128], index: 2, kind: output, shape index: {}]  }
   0x1   :  { %v19_v0 = vld [vmem:[%s393_s0 + $0x8] sm:$0xff]  ;;  %v18_v1 = vld [vmem:[%s393_s0] sm:$0xff]  ;;  %293 = vset.pattern.permute.xlu1 %v318_v2  ;;  %292 = vset.pattern.permute.xlu0 %v318_v2 }
   0x2   :  { %30 = vperm.xlu1 %293, %v19_v0   ;;  %27 = vperm.xlu0 %292, %v18_v1  }
   0x3   :  { %7 = vsyncpa [#allocation4], 0  ;;  %v23_v3 = vld [vmem:[%s393_s0 + $0x28] sm:$0xff]  ;;  %v22_v4 = vld [vmem:[%s393_s0 + $0x20] sm:$0xff]  ;;  %v16_v10 = vlaneseq  ;;  %vm74_vm0 = vcmask 64512   ;;  %v319_v14 = vmov 0.0  }
   0x4   :  { %v24_v5 = vld [vmem:[%s393_s0 + $0x30] sm:$0xff]  ;;  %v91_v7 = vld [vmem:[%s394_s1] sm:$0xff]  ;;  %v25_v8 = vld [vmem:[%s393_s0 + $0x38] sm:$0xff] }
   0x5   :  { %v20_v6 = vld [vmem:[%s393_s0 + $0x10] sm:$0xff]  ;;  %v21_v9 = vld [vmem:[%s393_s0 + $0x18] sm:$0xff]  ;;  %271 = vmatprep.subr.mxu0 %v91_v7  ;;  %285 = vmatprep.subr.mxu1 %v91_v7  ;;  %v17_v11 = vand.u32 127, %v16_v10  ;;  %s320_s0 = smov [#allocation3]  }
   0x6   :  { %42 = vperm.xlu1 %293, %v23_v3   ;;  %39 = vperm.xlu0 %292, %v22_v4   ;;  %s235_s1 = sshll.u32 %s320_s0, 4  ;;  %s236_s1 = int_to_ptr.vmem [resolvable:$true] %s235_s1 }
   0x7   :  { %272 = vmatpush3.msra.mxu0 %v91_v7  ;;  %286 = vmatpush3.msra.mxu1 %v91_v7  ;;  %s294_s27 = scalar_lea.vmem %s236_s1, 1024  ;;  %p299_p1 = scmp.lt.s32.totalorder %s236_s1, %s236_s1 }
   0x8   :  { %p295_p0 = scmp.ne.s32.totalorder %s236_s1, %s294_s27  ;;  %p300_p2 = scmp.lt.s32.totalorder %s294_s27, %s294_s27 }
   0xa   :  { %45 = vperm.xlu1 %293, %v24_v5   ;;  %33 = vperm.xlu0 %292, %v20_v6   ;;  %p301_p3 = por %p300_p2, %p299_p1 }
   0xc   :  { %p302_p4 = pnand %p301_p3, %p295_p0 }
   0xe   :  { %48 = vperm.xlu1 %293, %v25_v8   ;;  %36 = vperm.xlu0 %292, %v21_v9  }
  0x81   :  { %v31_v12 = vpop.permute.xlu1 %30  ;;  %v28_v13 = vpop.permute.xlu0 %27 }
  0x82   :  { %vm51_vm1 = vcmp.eq.s32.totalorder %v31_v12, %v17_v11  ;;  %vm50_vm2 = vcmp.eq.s32.totalorder %v28_v13, %v17_v11 }
  0x83   :  { %v247_v15 = vsel %vm51_vm1, 1.0, %v319_v14  ;;  %v246_v16 = vsel %vm50_vm2, 1.0, %v319_v14 }
  0x84   :  { %76 = vst.msk [vmem:[#allocation2 + $0x8] sm:$0xff] %vm74_vm0, %v247_v15  ;;  %75 = vst.msk [vmem:[#allocation2] sm:$0xff] %vm74_vm0, %v246_v16 }
  0x85   :  { %v43_v17 = vpop.permute.xlu1 %42  ;;  %v40_v18 = vpop.permute.xlu0 %39 }
  0x86   :  { %vm55_vm3 = vcmp.eq.s32.totalorder %v43_v17, %v17_v11  ;;  %vm54_vm4 = vcmp.eq.s32.totalorder %v40_v18, %v17_v11 }
  0x87   :  { %v251_v19 = vsel %vm55_vm3, 1.0, %v319_v14  ;;  %v250_v20 = vsel %vm54_vm4, 1.0, %v319_v14 }
  0x88   :  { %80 = vst.msk [vmem:[#allocation2 + $0x28] sm:$0xff] %vm74_vm0, %v251_v19  ;;  %79 = vst.msk [vmem:[#allocation2 + $0x20] sm:$0xff] %vm74_vm0, %v250_v20 }
  0x89   :  { %v46_v21 = vpop.permute.xlu1 %45  ;;  %v34_v22 = vpop.permute.xlu0 %33 }
  0x8a   :  { %vm56_vm5 = vcmp.eq.s32.totalorder %v46_v21, %v17_v11  ;;  %vm52_vm6 = vcmp.eq.s32.totalorder %v34_v22, %v17_v11 }
  0x8b   :  { %v252_v23 = vsel %vm56_vm5, 1.0, %v319_v14  ;;  %v248_v24 = vsel %vm52_vm6, 1.0, %v319_v14  ;;  %v83_v25 = vld [vmem:[#allocation2] sm:$0xff]  ;;  %v84_v26 = vld [vmem:[#allocation2 + $0x8] sm:$0xff] }
  0x8c   :  { %81 = vst.msk [vmem:[#allocation2 + $0x30] sm:$0xff] %vm74_vm0, %v252_v23  ;;  %77 = vst.msk [vmem:[#allocation2 + $0x10] sm:$0xff] %vm74_vm0, %v248_v24  ;;  %273 = vmatprep.mubr.msk.f32.mxu0 %vm74_vm0, %v83_v25 }
  0x8d   :  { %v49_v27 = vpop.permute.xlu1 %48  ;;  %v37_v28 = vpop.permute.xlu0 %36  ;;  %274 = vmatmul.mubr.msk.f32.vlgmr.msra.gmra.mrb[0].mxu0 %vm74_vm0, %v84_v26 }
  0x8e   :  { %vm57_vm7 = vcmp.eq.s32.totalorder %v49_v27, %v17_v11  ;;  %vm53_vm8 = vcmp.eq.s32.totalorder %v37_v28, %v17_v11 }
  0x8f   :  { %v253_v29 = vsel %vm57_vm7, 1.0, %v319_v14  ;;  %v249_v30 = vsel %vm53_vm8, 1.0, %v319_v14  ;;  %v87_v31 = vld [vmem:[#allocation2 + $0x20] sm:$0xff]  ;;  %v88_v32 = vld [vmem:[#allocation2 + $0x28] sm:$0xff] }
  0x90   :  { %82 = vst.msk [vmem:[#allocation2 + $0x38] sm:$0xff] %vm74_vm0, %v253_v29  ;;  %78 = vst.msk [vmem:[#allocation2 + $0x18] sm:$0xff] %vm74_vm0, %v249_v30  ;;  %279 = vmatprep.mubr.msk.f32.mxu1 %vm74_vm0, %v87_v31 }
  0x91   :  { %280 = vmatmul.mubr.msk.f32.vlgmr.msra.gmra.mrb[0].mxu1 %vm74_vm0, %v88_v32 }
  0x93   :  { %v85_v33 = vld [vmem:[#allocation2 + $0x10] sm:$0xff] }
  0x94   :  { %v89_v34 = vld [vmem:[#allocation2 + $0x30] sm:$0xff]  ;;  %276 = vmatprep.mubr.msk.f32.mxu0 %vm74_vm0, %v85_v33 }
  0x95   :  { %282 = vmatprep.mubr.msk.f32.mxu1 %vm74_vm0, %v89_v34 }
  0x97   :  { %v86_v35 = vld [vmem:[#allocation2 + $0x18] sm:$0xff] }
  0x98   :  { %v90_v36 = vld [vmem:[#allocation2 + $0x38] sm:$0xff]  ;;  %277 = vmatmul.mubr.msk.f32.gmra.mrb[2].mxu0 %vm74_vm0, %v86_v35 }
  0x99   :  { %283 = vmatmul.mubr.msk.f32.gmra.mrb[2].mxu1 %vm74_vm0, %v90_v36 }
 0x160   :  { %v275_v37 = vpop.f32.mrb[0].mxu0 }
 0x161   :  { %223 = vst [vmem:[#allocation3 + $0x8] sm:$0xff] %v275_v37  ;;  %v183_v38 = vpop.f32.mrb[1].mxu0 }
 0x162   :  { %222 = vst [vmem:[#allocation3] sm:$0xff] %v183_v38 }
 0x164   :  { %v281_v39 = vpop.f32.mrb[0].mxu1 }
 0x165   :  { %227 = vst [vmem:[#allocation3 + $0x28] sm:$0xff] %v281_v39  ;;  %v203_v40 = vpop.f32.mrb[1].mxu1 }
 0x166   :  { %226 = vst [vmem:[#allocation3 + $0x20] sm:$0xff] %v203_v40 }
 0x16b   :  { %v278_v41 = vpop.f32.mrb[2].mxu0 }
 0x16c   :  { %v284_v42 = vpop.f32.mrb[2].mxu1  ;;  %225 = vst [vmem:[#allocation3 + $0x18] sm:$0xff] %v278_v41  ;;  %v193_v43 = vpop.f32.mrb[3].mxu0 }
 0x16d   :  { %229 = vst [vmem:[#allocation3 + $0x38] sm:$0xff] %v284_v42  ;;  %v213_v44 = vpop.f32.mrb[3].mxu1  ;;  %224 = vst [vmem:[#allocation3 + $0x10] sm:$0xff] %v193_v43 }
 0x16e   :  { %228 = vst [vmem:[#allocation3 + $0x30] sm:$0xff] %v213_v44 }
 0x16f   :  { %305 = shalt.err (!%p302_p4)
}
 0x170   :  { %s306_s30 = scalar_lea.hbm %s395_s2, 1024 }
 0x171   :  { %p307_p5 = scmp.ne.s32.totalorder %s395_s2, %s306_s30  ;;  %p310_p6 = scmp.lt.u32.totalorder %s306_s30, %s395_s2 }
 0x173   :  { %p312_p7 = pnand %p310_p6, %p307_p5 }
 0x175   :  { %315 = shalt.err (!%p312_p7)
}
 0x176   :  { %s321_s7 = smov 128   ;;  %s322_s8 = smov 8  }
 0x177   :  { %241 = dma.vmem_to_hbm [thread:$0]  %s236_s1, 1024, %s395_s2, [#allocation4], %s321_s7, %s321_s7, %s322_s8  }
 0x178   :  { %316 = dma.done.wait [#allocation4], 1024  }
 0x179   :  { %317 = vsyncadd [#allocation4], 4294966272 }
 0x17a   :  { %245 = vsyncpa [#allocation4], 1 }

</bundles_post_ra>
